<compile_context>
chip_gen: v6e
topology: v6e:2x2x1
jax: 0.10.0
libtpu: 0.0.40
codegen_flags: <defaults>
</compile_context>

<pallas_src>
import jax
import jax.numpy as jnp
from jax import lax
from jax.experimental import pallas as pl
from jax.experimental.pallas import tpu as pltpu


def _pick_bt(B, L_out, max_lanes=16384):
    """Pick a batch-tile size: prefer a lane-dense slab (bt*L_out % 128 == 0),
    a bounded lane budget, and (when possible) >=2 grid steps for v7x's 2 TCs."""
    divisors = [d for d in range(1, B + 1) if B % d == 0]

    def score(d):
        n = d * L_out
        return (n <= max_lanes,        # fits a sane VMEM lane budget
                n % 128 == 0,          # lane-dense output slab (biggest lever)
                B // d >= 2,           # >=2 grid steps (v7x megacore sharding)
                d)                     # amortize ~0.35us/step overhead

    return max(divisors, key=score)


def conv_block(x, weight, bias, alpha, *, padding=2, bt=None,
               compute_dtype=jnp.float32):
    """Eval-mode ConvBlock forward (Conv1d -> InstanceNorm1d -> PReLU -> Dropout(id)).

    x:      (B, C_in, L)      float32
    weight: (C_out, C_in, K)  Conv1d weight
    bias:   (C_out,)          Conv1d bias (mathematically cancelled by InstanceNorm;
                              accepted for API parity, never computed)
    alpha:  scalar            PReLU slope (single shared parameter)
    """
    B, C_in, L = x.shape
    C_out, C_in_w, K = weight.shape
    assert C_in_w == C_in
    assert 2 * padding == K - 1, (
        "kernel assumes the ConvBlock defaults: stride=1 and 2*padding == K-1")
    L_out = L + 2 * padding - K + 1          # == L under the assert above

    if bt is None:
        bt = _pick_bt(B, L_out)
    assert B % bt == 0, "bt must divide B"
    n_steps = B // bt
    N = bt * L_out                            # matmul lane (N) dim per grid step
    eps = 1e-5
    inv_L = 1.0 / L_out
    direct_out = (L_out % 128 == 0)           # production path: no wrapper transpose

    # --- Wrapper-side layout plumbing (one cheap XLA pass over the small input) ---
    # Weight folded k-major over the contraction dim: w_flat[co, k*C_in+ci] = w[co,ci,k]
    w_flat = (jnp.transpose(weight, (0, 2, 1))
                 .reshape(C_out, K * C_in).astype(compute_dtype))
    # Lane-dense, contiguous per-step input slab: x_r[g, ci, b*L+t] = x[g*bt+b, ci, t]
    x_r = (x.reshape(n_steps, bt, C_in, L)
             .transpose(0, 2, 1, 3)
             .reshape(n_steps, C_in, bt * L)
             .astype(compute_dtype))
    # Segment-sum / segment-broadcast matrices for per-(b, c_out) InstanceNorm stats.
    col_b = jnp.arange(N, dtype=jnp.int32) // L_out
    seg = (col_b[:, None] == jnp.arange(bt, dtype=jnp.int32)[None, :]
           ).astype(jnp.float32)              # (N, bt)
    segt = jnp.transpose(seg)                 # (bt, N)
    alpha2 = jnp.asarray(alpha, jnp.float32).reshape(1, 1)
    # NOTE: `bias` is intentionally unused: InstanceNorm subtracts the per-(b,c) mean,
    # which removes any per-channel constant exactly, so the output is identical.

    def kernel(x_ref, w_ref, seg_ref, segt_ref, alpha_ref, o_ref, col_ref):
        # x_ref:    (1, C_in, bt*L)          lane-dense input slab (batch folded in lanes)
        # w_ref:    (C_out, K*C_in)          folded weight (k-major, ci-minor)
        # seg_ref:  (bt*L_out, bt)   f32     segment-sum matrix
        # segt_ref: (bt, bt*L_out)   f32     segment-broadcast matrix
        # alpha_ref:(1, 1)           SMEM    PReLU slope
        # o_ref:    (1, C_out, bt*L_out)  or  (bt, C_out, L_out)
        # col_ref:  (K*C_in, bt*L_out)       VMEM im2col buffer
        xflat = x_ref[0]                                         # (C_in, N)
        t_mod = lax.broadcasted_iota(jnp.int32, (C_in, N), 1) % L_out

        # --- im2col: K shifted taps, built in-register; zero-padding halo handled
        #     with lane masks (never materialized in HBM or a zero-filled buffer). ---
        for k in range(K):
            d = k - padding
            if d == 0:
                tap = xflat
            elif d > 0:
                tap = jnp.concatenate(
                    [xflat[:, d:], jnp.zeros((C_in, d), xflat.dtype)], axis=-1)
                tap = jnp.where(t_mod < (L_out - d), tap, 0)
            else:
                s = -d
                tap = jnp.concatenate(
                    [jnp.zeros((C_in, s), xflat.dtype), xflat[:, :N - s]], axis=-1)
                tap = jnp.where(t_mod >= s, tap, 0)
            col_ref[k * C_in:(k + 1) * C_in, :] = tap

        # --- Conv1d: ONE MXU matmul per grid step (contraction depth K*C_in,
        #     N = bt*L_out lanes).  Bias omitted: cancelled by InstanceNorm. ---
        acc = jnp.dot(w_ref[...], col_ref[...],
                      preferred_element_type=jnp.float32)        # (C_out, N) f32

        # --- InstanceNorm1d (affine=False, biased var, eps=1e-5): per-(b,c) stats
        #     via segmented reductions expressed as small f32 matmuls. ---
        seg_m = seg_ref[...]
        sums = jnp.dot(acc, seg_m, preferred_element_type=jnp.float32)       # (C_out, bt)
        sumsq = jnp.dot(acc * acc, seg_m, preferred_element_type=jnp.float32)
        mean = sums * inv_L
        var = jnp.maximum(sumsq * inv_L - mean * mean, 0.0)
        inv_std = lax.rsqrt(var + eps)                                       # (C_out, bt)
        segt_m = segt_ref[...]
        mean_full = jnp.dot(mean, segt_m, preferred_element_type=jnp.float32)   # (C_out, N)
        inv_full = jnp.dot(inv_std, segt_m, preferred_element_type=jnp.float32)
        yn = (acc - mean_full) * inv_full

        # --- PReLU (single shared parameter); Dropout: identity in eval mode. ---
        alpha_s = alpha_ref[0, 0]
        y = jnp.where(yn >= 0, yn, alpha_s * yn)

        if direct_out:
            # L_out % 128 == 0: aligned, unmasked lane-slab stores straight into the
            # (B, C_out, L_out) output -- no wrapper-side transpose pass.
            for b in range(bt):
                o_ref[b] = y[:, b * L_out:(b + 1) * L_out].astype(o_ref.dtype)
        else:
            # Toy / sub-128 L_out: single full-width store of the lane-dense slab.
            o_ref[0] = y.astype(o_ref.dtype)

    if direct_out:
        out_shape = jax.ShapeDtypeStruct((B, C_out, L_out), jnp.float32)
        out_spec = pl.BlockSpec((bt, C_out, L_out), lambda g: (g, 0, 0))
    else:
        out_shape = jax.ShapeDtypeStruct((n_steps, C_out, N), jnp.float32)
        out_spec = pl.BlockSpec((1, C_out, N), lambda g: (g, 0, 0))

    # VMEM budget: double-buffered in/out blocks + weight + seg matrices + im2col.
    isz = jnp.dtype(compute_dtype).itemsize
    work_bytes = (2 * C_in * bt * L * isz
                  + C_out * K * C_in * isz
                  + 2 * N * bt * 4
                  + K * C_in * N * isz
                  + 2 * C_out * N * 4)
    vmem_limit = int(min(max(4 * work_bytes, 32 * 1024 * 1024), 64 * 1024 * 1024))

    out_raw = pl.pallas_call(
        kernel,
        out_shape=out_shape,
        grid=(n_steps,),
        in_specs=[
            pl.BlockSpec((1, C_in, bt * L), lambda g: (g, 0, 0)),
            pl.BlockSpec((C_out, K * C_in), lambda g: (0, 0)),
            pl.BlockSpec((N, bt), lambda g: (0, 0)),
            pl.BlockSpec((bt, N), lambda g: (0, 0)),
            pl.BlockSpec(memory_space=pltpu.SMEM),
        ],
        out_specs=out_spec,
        scratch_shapes=[pltpu.VMEM((K * C_in, N), compute_dtype)],
        compiler_params=pltpu.CompilerParams(
            dimension_semantics=("parallel",),
            vmem_limit_bytes=vmem_limit,
        ),
    )(x_r, w_flat, seg, segt, alpha2)

    if direct_out:
        return out_raw
    # Un-fold the lane-dense slab back to (B, C_out, L_out) — layout plumbing only,
    # needed only for sub-128 L_out (toy shapes).
    out = out_raw.reshape(n_steps, C_out, bt, L_out).transpose(0, 2, 1, 3)
    return out.reshape(B, C_out, L_out)


def conv_block_ref(x, weight, bias, alpha, *, padding=2):
    """Pure-JAX reference matching PyTorch ConvBlock.forward in eval mode."""
    y = jax.lax.conv_general_dilated(
        x, weight,
        window_strides=(1,), padding=[(padding, padding)],
        dimension_numbers=("NCH", "OIH", "NCH"),
    ) + bias[None, :, None]
    mean = jnp.mean(y, axis=-1, keepdims=True)
    var = jnp.mean((y - mean) ** 2, axis=-1, keepdims=True)
    yn = (y - mean) / jnp.sqrt(var + 1e-5)
    return jnp.where(yn >= 0, yn, alpha * yn)


if __name__ == "__main__":
    key = jax.random.PRNGKey(0)
    B, C_in, C_out, L, K = 8, 4, 8, 16, 5
    k1, k2, k3 = jax.random.split(key, 3)

    x = jax.random.normal(k1, (B, C_in, L), jnp.float32)
    weight = 0.1 * jax.random.normal(k2, (C_out, C_in, K), jnp.float32)
    bias = 0.1 * jax.random.normal(k3, (C_out,), jnp.float32)
    alpha = jnp.float32(0.25)   # nn.PReLU default init

    ref = conv_block_ref(x, weight, bias, alpha)

    # Lane-dense slab: bt*L_out = 128, single grid step, f32 MXU path.
    out = conv_block(x, weight, bias, alpha, bt=8, compute_dtype=jnp.float32)
    jax.block_until_ready(out)
    assert out.shape == (B, C_out, L)
    assert jnp.allclose(out, ref, rtol=1e-4, atol=1e-4)

    # Two grid steps (exercises the pipelined grid / v7x megacore path), f32.
    out2 = conv_block(x, weight, bias, alpha, bt=4, compute_dtype=jnp.float32)
    jax.block_until_ready(out2)
    assert jnp.allclose(out2, ref, rtol=1e-4, atol=1e-4)

    # bf16 MXU inputs (v6e/v7x-native), f32 accumulation + f32 norm/PReLU.
    out_bf16 = conv_block(x, weight, bias, alpha, bt=8, compute_dtype=jnp.bfloat16)
    jax.block_until_ready(out_bf16)
    assert jnp.allclose(out_bf16, ref, rtol=1e-1, atol=1e-1)

    # Production-style path: L_out multiple of 128 -> direct (B, C_out, L_out) output,
    # no wrapper-side reshape/transpose pass.
    L2 = 128
    x2 = jax.random.normal(k1, (B, C_in, L2), jnp.float32)
    ref2 = conv_block_ref(x2, weight, bias, alpha)
    out3 = conv_block(x2, weight, bias, alpha, bt=2, compute_dtype=jnp.float32)
    jax.block_until_ready(out3)
    assert out3.shape == (B, C_out, L2)
    assert jnp.allclose(out3, ref2, rtol=1e-4, atol=1e-4)

    print("KERNEL_OK")
</pallas_src>

<mosaic_0001>
module attributes {stable_mosaic.version = 11 : i64} {
  func.func @kernel(%arg0: i32, %arg1: memref<1x4x128xf32, #tpu.memory_space<vmem>>, %arg2: memref<8x20xf32, #tpu.memory_space<vmem>>, %arg3: memref<128x8xf32, #tpu.memory_space<vmem>>, %arg4: memref<8x128xf32, #tpu.memory_space<vmem>>, %arg5: memref<1x1xf32, #tpu.memory_space<smem>>, %arg6: memref<1x8x128xf32, #tpu.memory_space<vmem>>, %arg7: memref<20x128xf32, #tpu.memory_space<vmem>>) attributes {dimension_semantics = [#tpu.dimension_semantics<parallel>], iteration_bounds = array<i64: 1>, scalar_prefetch = 0 : i64, scratch_operands = 1 : i64, tpu.core_type = #tpu.core_type<tc>, window_params = [{transform_indices = @transform_0, window_bounds = array<i64: 1, 4, 128>}, {pipeline_mode = #tpu.pipeline_mode<synchronous>, transform_indices = @transform_1, window_bounds = array<i64: 8, 20>}, {pipeline_mode = #tpu.pipeline_mode<synchronous>, transform_indices = @transform_2, window_bounds = array<i64: 128, 8>}, {pipeline_mode = #tpu.pipeline_mode<synchronous>, transform_indices = @transform_3, window_bounds = array<i64: 8, 128>}, {transform_indices = @transform_4, window_bounds = array<i64: 1, 1>}, {transform_indices = @transform_5, window_bounds = array<i64: 1, 8, 128>}]} {
    %c0 = arith.constant 0 : index
    %c0_0 = arith.constant 0 : index
    %c0_1 = arith.constant 0 : index
    %0 = vector.load %arg1[%c0, %c0_0, %c0_1] : memref<1x4x128xf32, #tpu.memory_space<vmem>>, vector<1x4x128xf32>
    %1 = vector.shape_cast %0 : vector<1x4x128xf32> to vector<4x128xf32>
    %2 = tpu.iota {dimensions = array<i32: 1>} : vector<4x128xi32>
    %c16_i32 = arith.constant 16 : i32
    %c0_i32 = arith.constant 0 : i32
    %3 = arith.cmpi eq, %c16_i32, %c0_i32 : i32
    %c1_i32 = arith.constant 1 : i32
    %4 = arith.select %3, %c1_i32, %c16_i32 : i32
    %5 = vector.broadcast %4 : i32 to vector<4x128xi32>
    %6 = arith.remsi %2, %5 : vector<4x128xi32>
    %c0_i32_2 = arith.constant 0 : i32
    %7 = vector.broadcast %c0_i32_2 : i32 to vector<4x128xi32>
    %8 = arith.cmpi ne, %6, %7 : vector<4x128xi32>
    %c0_i32_3 = arith.constant 0 : i32
    %9 = vector.broadcast %c0_i32_3 : i32 to vector<4x128xi32>
    %10 = arith.cmpi slt, %6, %9 : vector<4x128xi32>
    %c0_i32_4 = arith.constant 0 : i32
    %11 = arith.cmpi slt, %4, %c0_i32_4 : i32
    %12 = vector.broadcast %11 : i1 to vector<4x128xi1>
    %13 = vector.broadcast %12 : vector<4x128xi1> to vector<4x128xi1>
    %14 = arith.xori %10, %13 : vector<4x128xi1>
    %15 = arith.andi %14, %8 : vector<4x128xi1>
    %16 = vector.broadcast %4 : i32 to vector<4x128xi32>
    %17 = arith.addi %6, %16 : vector<4x128xi32>
    %18 = arith.select %15, %17, %6 : vector<4x128xi1>, vector<4x128xi32>
    %cst = arith.constant 0.000000e+00 : f32
    %19 = vector.broadcast %cst : f32 to vector<4x2xf32>
    %20 = vector.extract_strided_slice %1 {offsets = [0, 0], sizes = [4, 126], strides = [1, 1]} : vector<4x128xf32> to vector<4x126xf32>
    %21 = tpu.concatenate %19, %20 in 1 : vector<4x2xf32>, vector<4x126xf32> -> vector<4x128xf32>
    %c2_i32 = arith.constant 2 : i32
    %22 = vector.broadcast %c2_i32 : i32 to vector<4x128xi32>
    %23 = arith.cmpi sge, %18, %22 : vector<4x128xi32>
    %c0_i32_5 = arith.constant 0 : i32
    %24 = arith.sitofp %c0_i32_5 : i32 to f32
    %25 = vector.broadcast %24 : f32 to vector<4x128xf32>
    %26 = arith.select %23, %21, %25 : vector<4x128xi1>, vector<4x128xf32>
    %c0_6 = arith.constant 0 : index
    %c0_7 = arith.constant 0 : index
    %27 = vector.load %arg7[%c0_6, %c0_7] : memref<20x128xf32, #tpu.memory_space<vmem>>, vector<4x128xf32>
    tpu.vector_store %arg7[%c0_6, %c0_7], %26 {strides = array<i32>} : memref<20x128xf32, #tpu.memory_space<vmem>>, vector<4x128xf32>,
    %cst_8 = arith.constant 0.000000e+00 : f32
    %28 = vector.broadcast %cst_8 : f32 to vector<4x1xf32>
    %29 = vector.extract_strided_slice %1 {offsets = [0, 0], sizes = [4, 127], strides = [1, 1]} : vector<4x128xf32> to vector<4x127xf32>
    %30 = tpu.concatenate %28, %29 in 1 : vector<4x1xf32>, vector<4x127xf32> -> vector<4x128xf32>
    %c1_i32_9 = arith.constant 1 : i32
    %31 = vector.broadcast %c1_i32_9 : i32 to vector<4x128xi32>
    %32 = arith.cmpi sge, %18, %31 : vector<4x128xi32>
    %c0_i32_10 = arith.constant 0 : i32
    %33 = arith.sitofp %c0_i32_10 : i32 to f32
    %34 = vector.broadcast %33 : f32 to vector<4x128xf32>
    %35 = arith.select %32, %30, %34 : vector<4x128xi1>, vector<4x128xf32>
    %c4 = arith.constant 4 : index
    %c0_11 = arith.constant 0 : index
    %36 = vector.load %arg7[%c4, %c0_11] : memref<20x128xf32, #tpu.memory_space<vmem>>, vector<4x128xf32>
    tpu.vector_store %arg7[%c4, %c0_11], %35 {strides = array<i32>} : memref<20x128xf32, #tpu.memory_space<vmem>>, vector<4x128xf32>,
    %c8 = arith.constant 8 : index
    %c0_12 = arith.constant 0 : index
    %37 = vector.load %arg7[%c8, %c0_12] : memref<20x128xf32, #tpu.memory_space<vmem>>, vector<4x128xf32>
    tpu.vector_store %arg7[%c8, %c0_12], %1 {strides = array<i32>} : memref<20x128xf32, #tpu.memory_space<vmem>>, vector<4x128xf32>,
    %38 = vector.extract_strided_slice %1 {offsets = [0, 1], sizes = [4, 127], strides = [1, 1]} : vector<4x128xf32> to vector<4x127xf32>
    %cst_13 = arith.constant 0.000000e+00 : f32
    %39 = vector.broadcast %cst_13 : f32 to vector<4x1xf32>
    %40 = tpu.concatenate %38, %39 in 1 : vector<4x127xf32>, vector<4x1xf32> -> vector<4x128xf32>
    %c15_i32 = arith.constant 15 : i32
    %41 = vector.broadcast %c15_i32 : i32 to vector<4x128xi32>
    %42 = arith.cmpi slt, %18, %41 : vector<4x128xi32>
    %c0_i32_14 = arith.constant 0 : i32
    %43 = arith.sitofp %c0_i32_14 : i32 to f32
    %44 = vector.broadcast %43 : f32 to vector<4x128xf32>
    %45 = arith.select %42, %40, %44 : vector<4x128xi1>, vector<4x128xf32>
    %c12 = arith.constant 12 : index
    %c0_15 = arith.constant 0 : index
    %46 = vector.load %arg7[%c12, %c0_15] : memref<20x128xf32, #tpu.memory_space<vmem>>, vector<4x128xf32>
    tpu.vector_store %arg7[%c12, %c0_15], %45 {strides = array<i32>} : memref<20x128xf32, #tpu.memory_space<vmem>>, vector<4x128xf32>,
    %47 = vector.extract_strided_slice %1 {offsets = [0, 2], sizes = [4, 126], strides = [1, 1]} : vector<4x128xf32> to vector<4x126xf32>
    %cst_16 = arith.constant 0.000000e+00 : f32
    %48 = vector.broadcast %cst_16 : f32 to vector<4x2xf32>
    %49 = tpu.concatenate %47, %48 in 1 : vector<4x126xf32>, vector<4x2xf32> -> vector<4x128xf32>
    %c14_i32 = arith.constant 14 : i32
    %50 = vector.broadcast %c14_i32 : i32 to vector<4x128xi32>
    %51 = arith.cmpi slt, %18, %50 : vector<4x128xi32>
    %c0_i32_17 = arith.constant 0 : i32
    %52 = arith.sitofp %c0_i32_17 : i32 to f32
    %53 = vector.broadcast %52 : f32 to vector<4x128xf32>
    %54 = arith.select %51, %49, %53 : vector<4x128xi1>, vector<4x128xf32>
    %c16 = arith.constant 16 : index
    %c0_18 = arith.constant 0 : index
    %55 = vector.load %arg7[%c16, %c0_18] : memref<20x128xf32, #tpu.memory_space<vmem>>, vector<4x128xf32>
    tpu.vector_store %arg7[%c16, %c0_18], %54 {strides = array<i32>} : memref<20x128xf32, #tpu.memory_space<vmem>>, vector<4x128xf32>,
    %c0_19 = arith.constant 0 : index
    %c0_20 = arith.constant 0 : index
    %56 = vector.load %arg2[%c0_19, %c0_20] : memref<8x20xf32, #tpu.memory_space<vmem>>, vector<8x20xf32>
    %c0_21 = arith.constant 0 : index
    %c0_22 = arith.constant 0 : index
    %57 = vector.load %arg7[%c0_21, %c0_22] : memref<20x128xf32, #tpu.memory_space<vmem>>, vector<20x128xf32>
    %cst_23 = arith.constant dense<0.000000e+00> : vector<8x128xf32>
    %58 = tpu.matmul %56, %57, %cst_23 {dimension_numbers = #tpu.dot_dimension_numbers<[1], [0], [0], [1], [0, 0, 1, 1], [], []>} : vector<8x20xf32>, vector<20x128xf32>, vector<8x128xf32> -> vector<8x128xf32>
    %c0_24 = arith.constant 0 : index
    %c0_25 = arith.constant 0 : index
    %59 = vector.load %arg3[%c0_24, %c0_25] : memref<128x8xf32, #tpu.memory_space<vmem>>, vector<128x8xf32>
    %cst_26 = arith.constant dense<0.000000e+00> : vector<8x8xf32>
    %60 = tpu.matmul %58, %59, %cst_26 {dimension_numbers = #tpu.dot_dimension_numbers<[1], [0], [0], [1], [0, 0, 1, 1], [], []>} : vector<8x128xf32>, vector<128x8xf32>, vector<8x8xf32> -> vector<8x8xf32>
    %61 = arith.mulf %58, %58 : vector<8x128xf32>
    %cst_27 = arith.constant dense<0.000000e+00> : vector<8x8xf32>
    %62 = tpu.matmul %61, %59, %cst_27 {dimension_numbers = #tpu.dot_dimension_numbers<[1], [0], [0], [1], [0, 0, 1, 1], [], []>} : vector<8x128xf32>, vector<128x8xf32>, vector<8x8xf32> -> vector<8x8xf32>
    %cst_28 = arith.constant 6.250000e-02 : f32
    %63 = vector.broadcast %cst_28 : f32 to vector<8x8xf32>
    %64 = arith.mulf %60, %63 : vector<8x8xf32>
    %cst_29 = arith.constant 6.250000e-02 : f32
    %65 = vector.broadcast %cst_29 : f32 to vector<8x8xf32>
    %66 = arith.mulf %62, %65 : vector<8x8xf32>
    %67 = arith.mulf %64, %64 : vector<8x8xf32>
    %68 = arith.subf %66, %67 : vector<8x8xf32>
    %cst_30 = arith.constant 0.000000e+00 : f32
    %69 = vector.broadcast %cst_30 : f32 to vector<8x8xf32>
    %70 = arith.maximumf %68, %69 : vector<8x8xf32>
    %cst_31 = arith.constant 9.99999974E-6 : f32
    %71 = vector.broadcast %cst_31 : f32 to vector<8x8xf32>
    %72 = arith.addf %70, %71 : vector<8x8xf32>
    %73 = math.rsqrt %72 : vector<8x8xf32>
    %c0_32 = arith.constant 0 : index
    %c0_33 = arith.constant 0 : index
    %74 = vector.load %arg4[%c0_32, %c0_33] : memref<8x128xf32, #tpu.memory_space<vmem>>, vector<8x128xf32>
    %cst_34 = arith.constant dense<0.000000e+00> : vector<8x128xf32>
    %75 = tpu.matmul %64, %74, %cst_34 {dimension_numbers = #tpu.dot_dimension_numbers<[1], [0], [0], [1], [0, 0, 1, 1], [], []>} : vector<8x8xf32>, vector<8x128xf32>, vector<8x128xf32> -> vector<8x128xf32>
    %cst_35 = arith.constant dense<0.000000e+00> : vector<8x128xf32>
    %76 = tpu.matmul %73, %74, %cst_35 {dimension_numbers = #tpu.dot_dimension_numbers<[1], [0], [0], [1], [0, 0, 1, 1], [], []>} : vector<8x8xf32>, vector<8x128xf32>, vector<8x128xf32> -> vector<8x128xf32>
    %77 = arith.subf %58, %75 : vector<8x128xf32>
    %78 = arith.mulf %77, %76 : vector<8x128xf32>
    %c0_36 = arith.constant 0 : index
    %c0_37 = arith.constant 0 : index
    %79 = memref.load %arg5[%c0_36, %c0_37] : memref<1x1xf32, #tpu.memory_space<smem>>
    %cst_38 = arith.constant 0.000000e+00 : f32
    %80 = vector.broadcast %cst_38 : f32 to vector<8x128xf32>
    %81 = arith.cmpf oge, %78, %80 : vector<8x128xf32>
    %82 = vector.broadcast %79 : f32 to vector<8x128xf32>
    %83 = arith.mulf %82, %78 : vector<8x128xf32>
    %84 = arith.select %81, %78, %83 : vector<8x128xi1>, vector<8x128xf32>
    %c0_39 = arith.constant 0 : index
    %c0_40 = arith.constant 0 : index
    %c0_41 = arith.constant 0 : index
    %85 = vector.load %arg6[%c0_39, %c0_40, %c0_41] : memref<1x8x128xf32, #tpu.memory_space<vmem>>, vector<1x8x128xf32>
    %86 = vector.shape_cast %85 : vector<1x8x128xf32> to vector<8x128xf32>
    %87 = vector.shape_cast %84 : vector<8x128xf32> to vector<1x8x128xf32>
    tpu.vector_store %arg6[%c0_39, %c0_40, %c0_41], %87 {strides = array<i32>} : memref<1x8x128xf32, #tpu.memory_space<vmem>>, vector<1x8x128xf32>,
    return
  }
  func.func @transform_0(%arg0: i32) -> (i32, i32, i32) {
    %c0_i32 = arith.constant 0 : i32
    %c0_i32_0 = arith.constant 0 : i32
    %c0_i32_1 = arith.constant 0 : i32
    return %arg0, %c0_i32, %c0_i32_0 : i32, i32, i32
  }
  func.func @transform_1(%arg0: i32) -> (i32, i32) {
    %c0_i32 = arith.constant 0 : i32
    %c0_i32_0 = arith.constant 0 : i32
    %c0_i32_1 = arith.constant 0 : i32
    return %c0_i32, %c0_i32_0 : i32, i32
  }
  func.func @transform_2(%arg0: i32) -> (i32, i32) {
    %c0_i32 = arith.constant 0 : i32
    %c0_i32_0 = arith.constant 0 : i32
    %c0_i32_1 = arith.constant 0 : i32
    return %c0_i32, %c0_i32_0 : i32, i32
  }
  func.func @transform_3(%arg0: i32) -> (i32, i32) {
    %c0_i32 = arith.constant 0 : i32
    %c0_i32_0 = arith.constant 0 : i32
    %c0_i32_1 = arith.constant 0 : i32
    return %c0_i32, %c0_i32_0 : i32, i32
  }
  func.func @transform_4(%arg0: i32) -> (i32, i32) {
    %c0_i32 = arith.constant 0 : i32
    %c0_i32_0 = arith.constant 0 : i32
    %c0_i32_1 = arith.constant 0 : i32
    return %c0_i32, %c0_i32_0 : i32, i32
  }
  func.func @transform_5(%arg0: i32) -> (i32, i32, i32) {
    %c0_i32 = arith.constant 0 : i32
    %c0_i32_0 = arith.constant 0 : i32
    %c0_i32_1 = arith.constant 0 : i32
    return %arg0, %c0_i32, %c0_i32_0 : i32, i32, i32
  }
}

</mosaic_0001>

<bundles_post_ra>
// kernel: tpu_custom_call.1
= control target key start
LH: loop header
LB: loop body
LE: loop exit
PB: predicated region body
PF: predicated region fallthrough
CT: control target
= control target key end

     0   :  { %s653_s20 = smov 2   ;;  %s654_s21 = smov 126   ;;  %v655_v1 = vmov 0.0   ;;  %s860_s0 = inlined_call_operand.vmem [shape: f32[1,4,128], index: 0, kind: input, shape index: {}]   ;;  %s861_s1 = inlined_call_operand.vmem [shape: f32[8,20], index: 1, kind: input, shape index: {}]   ;;  %s862_s2 = inlined_call_operand.vmem [shape: f32[128,8], index: 2, kind: input, shape index: {}]   ;;  %s863_s3 = inlined_call_operand.vmem [shape: f32[8,128], index: 3, kind: input, shape index: {}]   ;;  %s864_s4 = inlined_call_operand.<no memory space> [shape: f32[1,1], index: 4, kind: input, shape index: {}]   ;;  %s865_s5 = inlined_call_operand.hbm [shape: f32[1,8,128], index: 5, kind: output, shape index: {}]  }
   0x1   :  { %v22_v0 = vld [vmem:[%s860_s0] sm:$0xf]  ;;  %533 = vmatprep.subr.mxu0 %v655_v1  ;;  %542 = vmatprep.subr.mxu1 %v655_v1 }
   0x2   :  { %38 = vrot.lane.b32.xlu1 %v22_v0, %s653_s20  ;;  %54 = vst [vmem:[#allocation2 + $0x8] sm:$0xf] %v22_v0  ;;  %63 = vrot.lane.b32.xlu0 %v22_v0, %s654_s21 }
   0x3   :  { %11 = vsyncpa [#allocation5], 0  ;;  %vm656_vm0 = vmmov 0   ;;  %s657_s22 = smov 1   ;;  %s658_s0 = smov 127   ;;  %v702_v2 = vld [vmem:[%s862_s2 + $0x78] sm:$0xff]  ;;  %v23_v17 = vlaneseq  ;;  %v469_v56 = vstv %s864_s4 }
   0x4   :  { %539 = vmatprep.mubr.msk.f32.mxu0 %vm656_vm0, %v655_v1  ;;  %574 = vmatprep.mubr.msk.f32.mxu1 %vm656_vm0, %v655_v1  ;;  %v707_v3 = vld [vmem:[%s862_s2 + $0x70] sm:$0xff]  ;;  %v714_v4 = vld [vmem:[%s862_s2 + $0x68] sm:$0xff]  ;;  %v721_v5 = vld [vmem:[%s862_s2 + $0x60] sm:$0xff]  ;;  %vm41_vm1 = vcmask 15360   ;;  %vm66_vm2 = vcmask 1031168   ;;  %vm49_vm5 = vcmask 7168  }
   0x5   :  { %543 = vmatpush3.msra.mxu1 %v702_v2  ;;  %v728_v6 = vld [vmem:[%s862_s2 + $0x58] sm:$0xff]  ;;  %v735_v7 = vld [vmem:[%s862_s2 + $0x50] sm:$0xff]  ;;  %v742_v8 = vld [vmem:[%s862_s2 + $0x48] sm:$0xff]  ;;  %v24_v18 = vand.u32 127, %v23_v17  ;;  %vm58_vm6 = vcmask 1039360   ;;  %vm79_vm9 = vcmask 1043456  }
   0x6   :  { %46 = vrot.lane.b32.xlu1 %v22_v0, %s657_s22  ;;  %55 = vrot.lane.b32.xlu0 %v22_v0, %s658_s0  ;;  %v749_v9 = vld [vmem:[%s862_s2 + $0x40] sm:$0xff]  ;;  %v756_v10 = vld [vmem:[%s862_s2 + $0x38] sm:$0xff]  ;;  %vm75_vm10 = vcmask 162816   ;;  %vm318_vm11 = vcmask 64512   ;;  %s659_s7 = smov [#allocation4]  }
   0x7   :  { %544 = vmatprep.subr.mxu1 %v655_v1  ;;  %v763_v11 = vld [vmem:[%s862_s2 + $0x30] sm:$0xff]  ;;  %v770_v12 = vld [vmem:[%s862_s2 + $0x28] sm:$0xff]  ;;  %v777_v13 = vld [vmem:[%s862_s2 + $0x20] sm:$0xff]  ;;  %v29_v19 = vand.u32 15, %v24_v18  ;;  %s479_s8 = sshll.u32 %s659_s7, 4  ;;  %s480_s8 = int_to_ptr.vmem [resolvable:$true] %s479_s8 }
   0x8   :  { %545 = vmatpush3.msra.mxu1 %v707_v3  ;;  %v784_v14 = vld [vmem:[%s862_s2 + $0x18] sm:$0xff]  ;;  %v791_v15 = vld [vmem:[%s862_s2 + $0x10] sm:$0xff]  ;;  %v798_v16 = vld [vmem:[%s862_s2 + $0x8] sm:$0xff]  ;;  %s631_s9 = scalar_lea.vmem %s480_s8, 128  ;;  %p636_p1 = scmp.lt.s32.totalorder %s480_s8, %s480_s8 }
   0x9   :  { %546 = vmatprep.subr.mxu1 %v655_v1  ;;  %vm43_vm3 = vcmp.ge.s32.totalorder %v29_v19, 2  ;;  %vm68_vm4 = vcmp.lt.s32.totalorder %v29_v19, 14  ;;  %vm51_vm7 = vcmp.ge.s32.totalorder %v29_v19, 1  ;;  %vm60_vm8 = vcmp.lt.s32.totalorder %v29_v19, 15  ;;  %v71_v34 = vld [vmem:[%s861_s1] sm:$0xff]  ;;  %p632_p0 = scmp.ne.s32.totalorder %s480_s8, %s631_s9  ;;  %p637_p2 = scmp.lt.s32.totalorder %s631_s9, %s631_s9 }
   0xa   :  { %547 = vmatpush3.msra.mxu1 %v714_v4  ;;  %v153_v36 = vld [vmem:[%s862_s2] sm:$0xff] }
   0xb   :  { %548 = vmatprep.subr.mxu1 %v655_v1  ;;  %v317_v40 = vld [vmem:[%s863_s3] sm:$0xff]  ;;  %p638_p3 = por %p637_p2, %p636_p1 }
   0xc   :  { %549 = vmatpush3.msra.mxu1 %v721_v5 }
   0xd   :  { %550 = vmatprep.subr.mxu1 %v655_v1  ;;  %p639_p4 = pnand %p638_p3, %p632_p0 }
   0xe   :  { %551 = vmatpush3.msra.mxu1 %v728_v6 }
   0xf   :  { %552 = vmatprep.subr.mxu1 %v655_v1 }
  0x10   :  { %553 = vmatpush3.msra.mxu1 %v735_v7 }
  0x11   :  { %554 = vmatprep.subr.mxu1 %v655_v1 }
  0x12   :  { %555 = vmatpush3.msra.mxu1 %v742_v8 }
  0x13   :  { %556 = vmatprep.subr.mxu1 %v655_v1 }
  0x14   :  { %557 = vmatpush3.msra.mxu1 %v749_v9 }
  0x15   :  { %558 = vmatprep.subr.mxu1 %v655_v1 }
  0x16   :  { %559 = vmatpush3.msra.mxu1 %v756_v10 }
  0x17   :  { %560 = vmatprep.subr.mxu1 %v655_v1 }
  0x18   :  { %561 = vmatpush3.msra.mxu1 %v763_v11 }
  0x19   :  { %562 = vmatprep.subr.mxu1 %v655_v1 }
  0x1a   :  { %563 = vmatpush3.msra.mxu1 %v770_v12 }
  0x1b   :  { %564 = vmatprep.subr.mxu1 %v655_v1 }
  0x1c   :  { %565 = vmatpush3.msra.mxu1 %v777_v13 }
  0x1d   :  { %566 = vmatprep.subr.mxu1 %v655_v1 }
  0x1e   :  { %567 = vmatpush3.msra.mxu1 %v784_v14 }
  0x1f   :  { %568 = vmatprep.subr.mxu1 %v655_v1 }
  0x20   :  { %569 = vmatpush3.msra.mxu1 %v791_v15 }
  0x21   :  { %570 = vmatprep.subr.mxu1 %v655_v1 }
  0x22   :  { %571 = vmatpush3.msra.mxu1 %v798_v16 }
  0x23   :  { %572 = vmatprep.subr.mxu1 %v655_v1 }
  0x24   :  { %573 = vmatpush3.msra.mxu1 %v153_v36 }
  0x25   :  { %612 = vmatprep.subr.mxu1 %v655_v1 }
  0x74   :  { %v39_v20 = vpop.permute.xlu1 %38  ;;  %v64_v21 = vpop.permute.xlu0 %63 }
  0x75   :  { %v42_v22 = vsel %vm41_vm1, 0.0, %v39_v20  ;;  %v67_v23 = vsel %vm66_vm2, %v64_v21, 0.0 }
  0x76   :  { %v44_v24 = vsel %vm43_vm3, %v42_v22, 0.0  ;;  %v69_v25 = vsel %vm68_vm4, %v67_v23, 0.0 }
  0x77   :  { %45 = vst [vmem:[#allocation2] sm:$0xf] %v44_v24  ;;  %70 = vst [vmem:[#allocation2 + $0x10] sm:$0xf] %v69_v25 }
  0x78   :  { %v47_v26 = vpop.permute.xlu1 %46  ;;  %v56_v27 = vpop.permute.xlu0 %55 }
  0x79   :  { %v50_v28 = vsel %vm49_vm5, 0.0, %v47_v26  ;;  %v59_v29 = vsel %vm58_vm6, %v56_v27, 0.0 }
  0x7a   :  { %v52_v30 = vsel %vm51_vm7, %v50_v28, 0.0  ;;  %v61_v31 = vsel %vm60_vm8, %v59_v29, 0.0 }
  0x7b   :  { %53 = vst [vmem:[#allocation2 + $0x4] sm:$0xf] %v52_v30  ;;  %62 = vst [vmem:[#allocation2 + $0xc] sm:$0xf] %v61_v31 }
  0x7e   :  { %v74_v32 = vld [vmem:[#allocation2 + $0x10] sm:$0xf] }
  0x7f   :  { %534 = vmatpush3.msk.msra.mxu0 %vm79_vm9, %v74_v32 }
  0x80   :  { %535 = vmatprep.subr.mxu0 %v655_v1 }
  0x82   :  { %v73_v33 = vld [vmem:[#allocation2 + $0x8] sm:$0xff]  ;;  %v72_v35 = vld [vmem:[#allocation2] sm:$0xff] }
  0x83   :  { %536 = vmatpush3.msra.mxu0 %v73_v33 }
  0x84   :  { %537 = vmatprep.subr.mxu0 %v655_v1 }
  0x85   :  { %538 = vmatpush3.msra.mxu0 %v72_v35 }
  0x86   :  { %540 = vmatmul.mubr.msk.f32.vlgmr.msra.gmra.mxu0 %vm75_vm10, %v71_v34  ;;  %577 = vmatprep.subr.mxu0 %v655_v1 }
  0x87   :  { %578 = vmatpush3.msra.mxu0 %v702_v2  ;;  %609 = vmatprep.mubr.msk.f32.mxu0 %vm656_vm0, %v655_v1 }
  0x88   :  { %579 = vmatprep.subr.mxu0 %v655_v1 }
  0x89   :  { %580 = vmatpush3.msra.mxu0 %v707_v3 }
  0x8a   :  { %581 = vmatprep.subr.mxu0 %v655_v1 }
  0x8b   :  { %582 = vmatpush3.msra.mxu0 %v714_v4 }
  0x8c   :  { %583 = vmatprep.subr.mxu0 %v655_v1 }
  0x8d   :  { %584 = vmatpush3.msra.mxu0 %v721_v5 }
  0x8e   :  { %585 = vmatprep.subr.mxu0 %v655_v1 }
  0x8f   :  { %586 = vmatpush3.msra.mxu0 %v728_v6 }
  0x90   :  { %587 = vmatprep.subr.mxu0 %v655_v1 }
  0x91   :  { %588 = vmatpush3.msra.mxu0 %v735_v7 }
  0x92   :  { %589 = vmatprep.subr.mxu0 %v655_v1 }
  0x93   :  { %590 = vmatpush3.msra.mxu0 %v742_v8 }
  0x94   :  { %591 = vmatprep.subr.mxu0 %v655_v1 }
  0x95   :  { %592 = vmatpush3.msra.mxu0 %v749_v9 }
  0x96   :  { %593 = vmatprep.subr.mxu0 %v655_v1 }
  0x97   :  { %594 = vmatpush3.msra.mxu0 %v756_v10 }
  0x98   :  { %595 = vmatprep.subr.mxu0 %v655_v1 }
  0x99   :  { %596 = vmatpush3.msra.mxu0 %v763_v11 }
  0x9a   :  { %597 = vmatprep.subr.mxu0 %v655_v1 }
  0x9b   :  { %598 = vmatpush3.msra.mxu0 %v770_v12 }
  0x9c   :  { %599 = vmatprep.subr.mxu0 %v655_v1 }
  0x9d   :  { %600 = vmatpush3.msra.mxu0 %v777_v13 }
  0x9e   :  { %601 = vmatprep.subr.mxu0 %v655_v1 }
  0x9f   :  { %602 = vmatpush3.msra.mxu0 %v784_v14 }
  0xa0   :  { %603 = vmatprep.subr.mxu0 %v655_v1 }
  0xa1   :  { %604 = vmatpush3.msra.mxu0 %v791_v15 }
  0xa2   :  { %605 = vmatprep.subr.mxu0 %v655_v1 }
  0xa3   :  { %606 = vmatpush3.msra.mxu0 %v798_v16 }
  0xa4   :  { %607 = vmatprep.subr.mxu0 %v655_v1 }
  0xa5   :  { %608 = vmatpush3.msra.mxu0 %v153_v36 }
 0x146   :  { %v149_v37 = vpop.f32.mrf.mxu0 }
 0x147   :  { %v239_v38 = vmul.f32 %v149_v37, %v149_v37  ;;  %575 = vmatmul.mubr.f32.vlgmr.msra.gmra.mxu1 %v149_v37 }
 0x148   :  { %v541_v39 = vpop.f32.mrf.mxu0  ;;  %614 = vmatprep.mubr.msk.f32.mxu1 %vm656_vm0, %v655_v1  ;;  %613 = vmatpush3.msra.mxu1 %v317_v40 }
 0x149   :  { %610 = vmatmul.mubr.f32.vlgmr.msra.gmra.mxu0 %v239_v38  ;;  %617 = vmatprep.subr.mxu1 %v655_v1 }
 0x207   :  { %v235_v41 = vpop.f32.mrf.mxu1 }
 0x208   :  { %v310_v42 = vmul.f32 0.0625, %v235_v41 }
 0x209   :  { %v576_v43 = vpop.f32.mrf.mxu1  ;;  %v306_v44 = vpop.f32.mrf.mxu0 }
 0x20a   :  { %v312_v45 = vmul.f32 %v310_v42, %v310_v42  ;;  %v311_v46 = vmul.f32 0.0625, %v306_v44  ;;  %615 = vmatmul.mubr.msk.f32.vlgmr.msra.gmra.mxu1 %vm318_vm11, %v310_v42 }
 0x20b   :  { %v611_v47 = vpop.f32.mrf.mxu0  ;;  %618 = vmatpush3.msra.mxu1 %v317_v40  ;;  %619 = vmatprep.mubr.msk.f32.mxu1 %vm656_vm0, %v655_v1 }
 0x20c   :  { %v313_v48 = vsub.f32 %v311_v46, %v312_v45 }
 0x20e   :  { %v314_v49 = vmax.f32 %v313_v48, 0.0 }
 0x210   :  { %v315_v50 = vadd.f32 1e-05, %v314_v49 }
 0x212   :  { %629 = vrsqrt.f32 %v315_v50 }
 0x21f   :  { %v630_v51 = vpop.eup %629 }
 0x220   :  { %620 = vmatmul.mubr.msk.f32.vlgmr.msra.gmra.mxu1 %vm318_vm11, %v630_v51 }
 0x2ca   :  { %v388_v52 = vpop.f32.mrf.mxu1 }
 0x2cb   :  { %v465_v54 = vsub.f32 %v149_v37, %v388_v52 }
 0x2cc   :  { %v616_v53 = vpop.f32.mrf.mxu1 }
 0x2e0   :  { %v461_v55 = vpop.f32.mrf.mxu1 }
 0x2e1   :  { %v466_v57 = vmul.f32 %v465_v54, %v461_v55 }
 0x2e2   :  { %v621_v58 = vpop.f32.mrf.mxu1 }
 0x2e3   :  { %v470_v59 = vmul.f32 %v469_v56, %v466_v57  ;;  %vm468_vm12 = vcmp.ge.f32.partialorder %v466_v57, 0.0 }
 0x2e5   :  { %v471_v60 = vsel %vm468_vm12, %v466_v57, %v470_v59 }
 0x2e6   :  { %472 = vst [vmem:[#allocation4] sm:$0xff] %v471_v60 }
 0x2e7   :  { %642 = shalt.err (!%p639_p4)
}
 0x2e8   :  { %482 = dma.vmem_to_hbm [thread:$0]  %s480_s8, 128, %s865_s5, [#allocation5]  }
 0x2e9   :  { %651 = dma.done.wait [#allocation5], 128  }
 0x2ea   :  { %652 = vsyncadd [#allocation5], 4294967168 }
 0x2eb   :  { %486 = vsyncpa [#allocation5], 1 }

</bundles_post_ra>
